<compile_context>
chip_gen: v7x
topology: tpu7x:2x2x1
jax: 0.10.0
libtpu: 0.0.40
codegen_flags: <defaults>
</compile_context>

<pallas_src>
import functools

import jax
import jax.numpy as jnp
from jax.experimental import pallas as pl
from jax.experimental.pallas import tpu as pltpu

_EPS = 1e-5  # torch.nn.BatchNorm1d default eps


def _round_up(x, m):
    return -(-x // m) * m


def _sepconv_kernel(x_ref, w1_ref, w2_ref, par1_ref, par2_ref, o_ref,
                    s1_ref, q1_ref, s2_ref, q2_ref, *,
                    K, S, cpg, TW, Lout, n_valid, n_phases, apply_bn, mxu_dtype):
    """Grid = (phase, sample, column-tile).

    With BN (Lout != 1), 3 phases:
      phase 0: depthwise conv -> accumulate BN1 sum / sum-of-squares      (no output write)
      phase 1: recompute, BN1+ReLU, 1x1 conv -> accumulate BN2 stats      (no output write)
      phase 2: recompute, BN1+ReLU, 1x1 conv, apply BN2 -> store tile
    Without BN (Lout == 1) a single phase adds the conv biases instead.
    """
    p = pl.program_id(0)
    n = pl.program_id(1)
    c = pl.program_id(2)
    TWH = x_ref.shape[-1]

    # Valid-column mask built in-kernel (iota + compare) instead of a DMA'd mask input.
    lane = jax.lax.broadcasted_iota(jnp.int32, (1, TW), 1)
    mask = (lane + c * TW < Lout).astype(jnp.float32)
    inv_cnt = 1.0 / float(n_valid)

    def depthwise():
        # Grouped / depthwise conv on the VPU: broadcast FMA per (j, k) tap.  Tap shift d uses an
        # XLU rotate of the resident lane-aligned slab; halo columns are baked into the tile.
        acc = jnp.zeros((x_ref.shape[-2], TW), jnp.float32)
        for j in range(cpg):
            for k in range(K):
                r, d = k % S, k // S
                slab = x_ref[0, r * cpg + j]                       # (C_pad, TW + halo) f32
                if d:
                    slab = pltpu.roll(slab, TWH - d, axis=1)       # rotate-left by d lanes
                acc = acc + w1_ref[:, j * K + k:j * K + k + 1] * slab[:, :TW]
        return acc

    def pointwise(h):
        # 1x1 conv on the MXU; cast to the MXU operand dtype only right before the dot.
        return jnp.dot(w2_ref[...], h.astype(mxu_dtype),
                       preferred_element_type=jnp.float32)

    if apply_bn:
        @pl.when(jnp.logical_and(p == 0, jnp.logical_and(n == 0, c == 0)))
        def _init():
            s1_ref[...] = jnp.zeros_like(s1_ref)
            q1_ref[...] = jnp.zeros_like(q1_ref)
            s2_ref[...] = jnp.zeros_like(s2_ref)
            q2_ref[...] = jnp.zeros_like(q2_ref)

        def bn1_scale_shift():
            m1 = s1_ref[...] * inv_cnt
            v1 = jnp.maximum(q1_ref[...] * inv_cnt - m1 * m1, 0.0)
            sc1 = par1_ref[:, 1:2] * jax.lax.rsqrt(v1 + _EPS)      # gamma folded into the scale
            return sc1, par1_ref[:, 2:3] - m1 * sc1
        # NOTE: conv biases cancel exactly under batch-mean subtraction -> skipped in the BN path.

        @pl.when(p == 0)
        def _accum_bn1():
            y1 = depthwise() * mask
            s1_ref[...] += jnp.sum(y1, axis=1, keepdims=True)
            q1_ref[...] += jnp.sum(y1 * y1, axis=1, keepdims=True)

        @pl.when(p == 1)
        def _accum_bn2():
            sc1, sh1 = bn1_scale_shift()
            h = jnp.maximum(depthwise() * sc1 + sh1, 0.0) * mask   # masked cols -> 0 -> y2 cols 0
            y2 = pointwise(h)
            s2_ref[...] += jnp.sum(y2, axis=1, keepdims=True)
            q2_ref[...] += jnp.sum(y2 * y2, axis=1, keepdims=True)

        @pl.when(p == n_phases - 1)
        def _finalize():
            sc1, sh1 = bn1_scale_shift()
            h = jnp.maximum(depthwise() * sc1 + sh1, 0.0) * mask
            y2 = pointwise(h)
            m2 = s2_ref[...] * inv_cnt
            v2 = jnp.maximum(q2_ref[...] * inv_cnt - m2 * m2, 0.0)
            sc2 = par2_ref[:, 1:2] * jax.lax.rsqrt(v2 + _EPS)
            sh2 = par2_ref[:, 2:3] - m2 * sc2
            o_ref[0, :, :] = ((y2 * sc2 + sh2) * mask).astype(o_ref.dtype)
    else:
        # Spatial length == 1: BatchNorm is skipped in the reference module -> add conv biases.
        h = jnp.maximum(depthwise() + par1_ref[:, 0:1], 0.0) * mask
        o_ref[0, :, :] = ((pointwise(h) + par2_ref[:, 0:1]) * mask).astype(o_ref.dtype)


@functools.partial(jax.jit, static_argnames=("stride", "groups", "mxu_dtype"))
def sepconv_forward(x, params, *, stride, groups, mxu_dtype=jnp.bfloat16):
    """x: (N, Cin, L) float32, PyTorch NCL layout. Returns (N, Cout, Lout) float32."""
    w1, b1, g1, be1, w2, b2, g2, be2 = params
    N, C, L = x.shape
    Cout = w2.shape[0]
    K = w1.shape[-1]
    assert C % groups == 0 and w1.shape == (C, C // groups, K)
    cpg = C // groups
    pad = K // 2
    S = stride
    Lout = (L + 2 * pad - K) // S + 1
    D = (K - 1) // S                     # max in-phase tap shift
    Lph = Lout + D
    Ltot = S * Lph

    apply_bn = Lout != 1                 # mirrors `if x.size()[-1] != 1`
    n_phases = 3 if apply_bn else 1

    C_pad = _round_up(C, 8)              # sublane-dense channel dims
    Co_pad = _round_up(Cout, 8)
    W = _round_up(Lout, 128)             # per-sample lane width (lane-dense)
    # Column tile: largest 128-multiple <= 1024 dividing W (keeps tiles well under v7x's 64 MiB).
    TW = next(t for t in (1024, 512, 256, 128) if W % t == 0)
    Tw = W // TW
    H = 128 if D > 0 else 0              # halo lanes baked into each input tile
    assert D <= max(H, 0)
    TWH = TW + H

    # ---- glue (one fused XLA pass): group gather, pad, phase split, per-tile halo layout ----
    # TODO(synk): for large L/C fold this phase-split into the kernel (strided pl.ds loads from
    # the raw (N, C, L) layout) so the input is not rewritten in HBM before the kernel runs.
    gidx = (jnp.arange(C) // cpg)[None, :] * cpg + jnp.arange(cpg)[:, None]     # (cpg, C)
    xg = x[:, gidx, :]                                                          # (N,cpg,C,L)
    xp = jnp.pad(xg, ((0, 0), (0, 0), (0, 0), (pad, max(Ltot - L - pad, 0))))[..., :Ltot]
    ph = xp.reshape(N, cpg, C, Lph, S).transpose(4, 1, 2, 0, 3)                 # (S,cpg,C,N,Lph)
    ph = jnp.pad(ph, ((0, 0), (0, 0), (0, C_pad - C), (0, 0), (0, W + H - Lph)))
    tiles = jnp.stack([ph[..., t * TW:t * TW + TWH] for t in range(Tw)], axis=4)
    xtile = tiles.transpose(3, 4, 0, 1, 2, 5).reshape(N * Tw, S * cpg, C_pad, TWH)
    xtile = xtile.astype(jnp.float32)    # depthwise conv runs on the VPU in f32 (v5e-friendly)

    # ---- small operands: per-tap VPU weights, padded MXU weight, packed per-channel params ----
    w1p = jnp.pad(w1.reshape(C, cpg * K), ((0, C_pad - C), (0, 0))).astype(jnp.float32)
    w2m = jnp.pad(w2[:, :, 0], ((0, Co_pad - Cout), (0, C_pad - C))).astype(mxu_dtype)

    def pack(cols, rows):                # one (rows, 8) operand instead of many (rows, 1) DMAs
        a = jnp.stack([jnp.pad(v.astype(jnp.float32), (0, rows - v.shape[0])) for v in cols], 1)
        return jnp.pad(a, ((0, 0), (0, 8 - a.shape[1])))
    par1 = pack([b1, g1, be1], C_pad)    # columns: bias, gamma, beta
    par2 = pack([b2, g2, be2], Co_pad)

    kernel = functools.partial(
        _sepconv_kernel, K=K, S=S, cpg=cpg, TW=TW, Lout=Lout, n_valid=N * Lout,
        n_phases=n_phases, apply_bn=apply_bn, mxu_dtype=mxu_dtype)

    last = n_phases - 1
    x_map = lambda p, n_, c_: (n_ * Tw + c_, 0, 0, 0)
    const2 = lambda p, n_, c_: (0, 0)
    # Statistics phases pin the (never-written) output block at (0,0,0), so no garbage is ever
    # written back to HBM; only the final phase walks the real output tiles.
    out_map = lambda p, n_, c_: (jnp.where(p == last, n_, 0), 0, jnp.where(p == last, c_, 0))

    # VMEM budget: double-buffered x tile + output tile + resident small operands, with headroom.
    tile_bytes = S * cpg * C_pad * TWH * 4 + Co_pad * TW * 4
    vmem_limit = int(min(48 * 2 ** 20, max(8 * 2 ** 20, 6 * tile_bytes)))

    out = pl.pallas_call(
        kernel,
        out_shape=jax.ShapeDtypeStruct((N, Co_pad, W), jnp.float32),
        grid_spec=pltpu.PrefetchScalarGridSpec(
            num_scalar_prefetch=0,
            grid=(n_phases, N, Tw),
            in_specs=[
                pl.BlockSpec((1, S * cpg, C_pad, TWH), x_map),
                pl.BlockSpec((C_pad, cpg * K), const2),
                pl.BlockSpec((Co_pad, C_pad), const2),
                pl.BlockSpec((C_pad, 8), const2),
                pl.BlockSpec((Co_pad, 8), const2),
            ],
            out_specs=pl.BlockSpec((1, Co_pad, TW), out_map),
            scratch_shapes=[pltpu.VMEM((C_pad, 1), jnp.float32),
                            pltpu.VMEM((C_pad, 1), jnp.float32),
                            pltpu.VMEM((Co_pad, 1), jnp.float32),
                            pltpu.VMEM((Co_pad, 1), jnp.float32)],
        ),
        # BN statistics accumulate across the whole grid -> all axes 'arbitrary'.
        # TODO(synk): shard the sample axis as 'parallel' for v7x's 2 TensorCores once the BN
        # partial sums are reduced across cores (CMEM / semaphores) instead of a serial grid.
        compiler_params=pltpu.CompilerParams(
            dimension_semantics=("arbitrary", "arbitrary", "arbitrary"),
            vmem_limit_bytes=vmem_limit),
    )(xtile, w1p, w2m, par1, par2)

    return out[:, :Cout, :Lout]


def ref_forward(x, params, *, stride, groups, pointwise_dtype=None):
    """Pure-JAX reference matching the PyTorch forward (training-mode BN).

    pointwise_dtype: optionally round the 1x1-conv operands through this dtype, mirroring the
    kernel's bf16 MXU operands while keeping all other math in f32.
    """
    w1, b1, g1, be1, w2, b2, g2, be2 = params
    K = w1.shape[-1]
    pad = K // 2
    hi = jax.lax.Precision.HIGHEST
    y = jax.lax.conv_general_dilated(
        x, w1, window_strides=(stride,), padding=((pad, pad),),
        dimension_numbers=('NCH', 'OIH', 'NCH'),
        feature_group_count=groups, precision=hi) + b1[None, :, None]
    if y.shape[-1] != 1:
        m = y.mean(axis=(0, 2), keepdims=True)
        v = ((y - m) ** 2).mean(axis=(0, 2), keepdims=True)
        y = (y - m) / jnp.sqrt(v + _EPS) * g1[None, :, None] + be1[None, :, None]
    y = jnp.maximum(y, 0.0)
    w2c = w2
    if pointwise_dtype is not None:
        y = y.astype(pointwise_dtype).astype(jnp.float32)
        w2c = w2.astype(pointwise_dtype).astype(jnp.float32)
    z = jax.lax.conv_general_dilated(
        y, w2c, window_strides=(1,), padding=((0, 0),),
        dimension_numbers=('NCH', 'OIH', 'NCH'), precision=hi) + b2[None, :, None]
    if z.shape[-1] != 1:
        m = z.mean(axis=(0, 2), keepdims=True)
        v = ((z - m) ** 2).mean(axis=(0, 2), keepdims=True)
        z = (z - m) / jnp.sqrt(v + _EPS) * g2[None, :, None] + be2[None, :, None]
    return z


if __name__ == "__main__":
    # SepConv(in_channels=8, out_channels=4, stride=2); first conv uses groups=out_channels.
    N, Cin, Cout, L, stride, K = 2, 8, 4, 16, 2, 3
    groups = Cout
    cpg = Cin // groups

    key = jax.random.PRNGKey(0)
    ks = jax.random.split(key, 9)
    w1 = 0.2 * jax.random.normal(ks[0], (Cin, cpg, K), jnp.float32)   # grouped conv weight
    b1 = 0.1 * jax.random.normal(ks[1], (Cin,), jnp.float32)
    g1 = 1.0 + 0.1 * jax.random.normal(ks[2], (Cin,), jnp.float32)    # BN1 gamma
    be1 = 0.1 * jax.random.normal(ks[3], (Cin,), jnp.float32)         # BN1 beta
    w2 = 0.2 * jax.random.normal(ks[4], (Cout, Cin, 1), jnp.float32)  # 1x1 conv weight
    b2 = 0.1 * jax.random.normal(ks[5], (Cout,), jnp.float32)
    g2 = 1.0 + 0.1 * jax.random.normal(ks[6], (Cout,), jnp.float32)   # BN2 gamma
    be2 = 0.1 * jax.random.normal(ks[7], (Cout,), jnp.float32)        # BN2 beta
    x = jax.random.normal(ks[8], (N, Cin, L), jnp.float32)
    params = (w1, b1, g1, be1, w2, b2, g2, be2)

    out = jax.block_until_ready(sepconv_forward(x, params, stride=stride, groups=groups))

    Lout = (L + 2 * (K // 2) - K) // stride + 1
    assert out.shape == (N, Cout, Lout)

    # Tight check: reference whose 1x1-conv operands are rounded through bf16 like the kernel.
    ref_bf = ref_forward(x, params, stride=stride, groups=groups, pointwise_dtype=jnp.bfloat16)
    assert jnp.allclose(out, ref_bf, atol=2e-2, rtol=2e-2), \
        float(jnp.max(jnp.abs(out - ref_bf)))
    # Loose sanity check against the pure-f32 PyTorch-equivalent reference (bf16 rounding of the
    # pointwise conv gets amplified by the second training-mode BatchNorm).
    ref_f32 = ref_forward(x, params, stride=stride, groups=groups)
    assert jnp.allclose(out, ref_f32, atol=2e-1, rtol=2e-1), \
        float(jnp.max(jnp.abs(out - ref_f32)))
    print("KERNEL_OK")
</pallas_src>

<mosaic_0001>
module attributes {stable_mosaic.version = 11 : i64} {
  func.func @_sepconv_kernel(%arg0: i32, %arg1: i32, %arg2: i32, %arg3: memref<1x4x8x256xf32, #tpu.memory_space<vmem>>, %arg4: memref<8x6xf32, #tpu.memory_space<vmem>>, %arg5: memref<8x8xbf16, #tpu.memory_space<vmem>>, %arg6: memref<8x8xf32, #tpu.memory_space<vmem>>, %arg7: memref<8x8xf32, #tpu.memory_space<vmem>>, %arg8: memref<1x8x128xf32, #tpu.memory_space<vmem>>, %arg9: memref<8x1xf32, #tpu.memory_space<vmem>>, %arg10: memref<8x1xf32, #tpu.memory_space<vmem>>, %arg11: memref<8x1xf32, #tpu.memory_space<vmem>>, %arg12: memref<8x1xf32, #tpu.memory_space<vmem>>) attributes {dimension_semantics = [#tpu.dimension_semantics<arbitrary>, #tpu.dimension_semantics<arbitrary>, #tpu.dimension_semantics<arbitrary>], iteration_bounds = array<i64: 3, 2, 1>, scalar_prefetch = 0 : i64, scratch_operands = 4 : i64, tpu.core_type = #tpu.core_type<tc>, window_params = [{transform_indices = @transform_0, window_bounds = array<i64: 1, 4, 8, 256>}, {pipeline_mode = #tpu.pipeline_mode<synchronous>, transform_indices = @transform_1, window_bounds = array<i64: 8, 6>}, {pipeline_mode = #tpu.pipeline_mode<synchronous>, transform_indices = @transform_2, window_bounds = array<i64: 8, 8>}, {pipeline_mode = #tpu.pipeline_mode<synchronous>, transform_indices = @transform_3, window_bounds = array<i64: 8, 8>}, {pipeline_mode = #tpu.pipeline_mode<synchronous>, transform_indices = @transform_4, window_bounds = array<i64: 8, 8>}, {transform_indices = @transform_5, window_bounds = array<i64: 1, 8, 128>}]} {
    %0 = tpu.iota {dimensions = array<i32: 1>} : vector<1x128xi32>
    %c128_i32 = arith.constant 128 : i32
    %1 = arith.muli %arg2, %c128_i32 : i32
    %2 = vector.broadcast %1 : i32 to vector<1x128xi32>
    %3 = arith.addi %0, %2 : vector<1x128xi32>
    %c8_i32 = arith.constant 8 : i32
    %4 = vector.broadcast %c8_i32 : i32 to vector<1x128xi32>
    %5 = arith.cmpi slt, %3, %4 : vector<1x128xi32>
    %6 = arith.extui %5 : vector<1x128xi1> to vector<1x128xi32>
    %7 = arith.sitofp %6 : vector<1x128xi32> to vector<1x128xf32>
    %c0_i32 = arith.constant 0 : i32
    %8 = arith.cmpi eq, %arg0, %c0_i32 : i32
    %c0_i32_0 = arith.constant 0 : i32
    %9 = arith.cmpi eq, %arg1, %c0_i32_0 : i32
    %c0_i32_1 = arith.constant 0 : i32
    %10 = arith.cmpi eq, %arg2, %c0_i32_1 : i32
    %11 = arith.andi %9, %10 : i1
    %12 = arith.andi %8, %11 : i1
    %13 = arith.extui %12 : i1 to i32
    %c0_i32_2 = arith.constant 0 : i32
    %14 = arith.cmpi ne, %13, %c0_i32_2 : i32
    scf.if %14 {
      %cst = arith.constant 0.000000e+00 : f32
      %24 = vector.broadcast %cst : f32 to vector<8x1xf32>
      %c0 = arith.constant 0 : index
      %c0_7 = arith.constant 0 : index
      %25 = vector.load %arg9[%c0, %c0_7] : memref<8x1xf32, #tpu.memory_space<vmem>>, vector<8x1xf32>
      tpu.vector_store %arg9[%c0, %c0_7], %24 {strides = array<i32>} : memref<8x1xf32, #tpu.memory_space<vmem>>, vector<8x1xf32>,
      %cst_8 = arith.constant 0.000000e+00 : f32
      %26 = vector.broadcast %cst_8 : f32 to vector<8x1xf32>
      %c0_9 = arith.constant 0 : index
      %c0_10 = arith.constant 0 : index
      %27 = vector.load %arg10[%c0_9, %c0_10] : memref<8x1xf32, #tpu.memory_space<vmem>>, vector<8x1xf32>
      tpu.vector_store %arg10[%c0_9, %c0_10], %26 {strides = array<i32>} : memref<8x1xf32, #tpu.memory_space<vmem>>, vector<8x1xf32>,
      %cst_11 = arith.constant 0.000000e+00 : f32
      %28 = vector.broadcast %cst_11 : f32 to vector<8x1xf32>
      %c0_12 = arith.constant 0 : index
      %c0_13 = arith.constant 0 : index
      %29 = vector.load %arg11[%c0_12, %c0_13] : memref<8x1xf32, #tpu.memory_space<vmem>>, vector<8x1xf32>
      tpu.vector_store %arg11[%c0_12, %c0_13], %28 {strides = array<i32>} : memref<8x1xf32, #tpu.memory_space<vmem>>, vector<8x1xf32>,
      %cst_14 = arith.constant 0.000000e+00 : f32
      %30 = vector.broadcast %cst_14 : f32 to vector<8x1xf32>
      %c0_15 = arith.constant 0 : index
      %c0_16 = arith.constant 0 : index
      %31 = vector.load %arg12[%c0_15, %c0_16] : memref<8x1xf32, #tpu.memory_space<vmem>>, vector<8x1xf32>
      tpu.vector_store %arg12[%c0_15, %c0_16], %30 {strides = array<i32>} : memref<8x1xf32, #tpu.memory_space<vmem>>, vector<8x1xf32>,
    } else {
    }
    %c0_i32_3 = arith.constant 0 : i32
    %15 = arith.cmpi eq, %arg0, %c0_i32_3 : i32
    %16 = arith.extui %15 : i1 to i32
    %c0_i32_4 = arith.constant 0 : i32
    %17 = arith.cmpi ne, %16, %c0_i32_4 : i32
    scf.if %17 {
      %cst = arith.constant 0.000000e+00 : f32
      %24 = vector.broadcast %cst : f32 to vector<8x128xf32>
      %c0 = arith.constant 0 : index
      %c0_7 = arith.constant 0 : index
      %c0_8 = arith.constant 0 : index
      %c0_9 = arith.constant 0 : index
      %25 = vector.load %arg3[%c0, %c0_7, %c0_8, %c0_9] : memref<1x4x8x256xf32, #tpu.memory_space<vmem>>, vector<1x1x8x256xf32>
      %26 = vector.shape_cast %25 : vector<1x1x8x256xf32> to vector<8x256xf32>
      %c0_10 = arith.constant 0 : index
      %c0_11 = arith.constant 0 : index
      %27 = vector.load %arg4[%c0_10, %c0_11] : memref<8x6xf32, #tpu.memory_space<vmem>>, vector<8x1xf32>
      %28 = vector.extract_strided_slice %26 {offsets = [0, 0], sizes = [8, 128], strides = [1, 1]} : vector<8x256xf32> to vector<8x128xf32>
      %29 = vector.broadcast %27 : vector<8x1xf32> to vector<8x128xf32>
      %30 = arith.mulf %29, %28 : vector<8x128xf32>
      %31 = arith.addf %24, %30 : vector<8x128xf32>
      %c0_12 = arith.constant 0 : index
      %c2 = arith.constant 2 : index
      %c0_13 = arith.constant 0 : index
      %c0_14 = arith.constant 0 : index
      %32 = vector.load %arg3[%c0_12, %c2, %c0_13, %c0_14] : memref<1x4x8x256xf32, #tpu.memory_space<vmem>>, vector<1x1x8x256xf32>
      %33 = vector.shape_cast %32 : vector<1x1x8x256xf32> to vector<8x256xf32>
      %c0_15 = arith.constant 0 : index
      %c1 = arith.constant 1 : index
      %34 = vector.load %arg4[%c0_15, %c1] : memref<8x6xf32, #tpu.memory_space<vmem>>, vector<8x1xf32>
      %35 = vector.extract_strided_slice %33 {offsets = [0, 0], sizes = [8, 128], strides = [1, 1]} : vector<8x256xf32> to vector<8x128xf32>
      %36 = vector.broadcast %34 : vector<8x1xf32> to vector<8x128xf32>
      %37 = arith.mulf %36, %35 : vector<8x128xf32>
      %38 = arith.addf %31, %37 : vector<8x128xf32>
      %c0_16 = arith.constant 0 : index
      %c0_17 = arith.constant 0 : index
      %c0_18 = arith.constant 0 : index
      %c0_19 = arith.constant 0 : index
      %39 = vector.load %arg3[%c0_16, %c0_17, %c0_18, %c0_19] : memref<1x4x8x256xf32, #tpu.memory_space<vmem>>, vector<1x1x8x256xf32>
      %40 = vector.shape_cast %39 : vector<1x1x8x256xf32> to vector<8x256xf32>
      %c255_i32 = arith.constant 255 : i32
      %41 = tpu.dynamic_rotate %40 by %c255_i32 dim 1 : vector<8x256xf32>, i32 -> vector<8x256xf32>
      %c0_20 = arith.constant 0 : index
      %c2_21 = arith.constant 2 : index
      %42 = vector.load %arg4[%c0_20, %c2_21] : memref<8x6xf32, #tpu.memory_space<vmem>>, vector<8x1xf32>
      %43 = vector.extract_strided_slice %41 {offsets = [0, 0], sizes = [8, 128], strides = [1, 1]} : vector<8x256xf32> to vector<8x128xf32>
      %44 = vector.broadcast %42 : vector<8x1xf32> to vector<8x128xf32>
      %45 = arith.mulf %44, %43 : vector<8x128xf32>
      %46 = arith.addf %38, %45 : vector<8x128xf32>
      %c0_22 = arith.constant 0 : index
      %c1_23 = arith.constant 1 : index
      %c0_24 = arith.constant 0 : index
      %c0_25 = arith.constant 0 : index
      %47 = vector.load %arg3[%c0_22, %c1_23, %c0_24, %c0_25] : memref<1x4x8x256xf32, #tpu.memory_space<vmem>>, vector<1x1x8x256xf32>
      %48 = vector.shape_cast %47 : vector<1x1x8x256xf32> to vector<8x256xf32>
      %c0_26 = arith.constant 0 : index
      %c3 = arith.constant 3 : index
      %49 = vector.load %arg4[%c0_26, %c3] : memref<8x6xf32, #tpu.memory_space<vmem>>, vector<8x1xf32>
      %50 = vector.extract_strided_slice %48 {offsets = [0, 0], sizes = [8, 128], strides = [1, 1]} : vector<8x256xf32> to vector<8x128xf32>
      %51 = vector.broadcast %49 : vector<8x1xf32> to vector<8x128xf32>
      %52 = arith.mulf %51, %50 : vector<8x128xf32>
      %53 = arith.addf %46, %52 : vector<8x128xf32>
      %c0_27 = arith.constant 0 : index
      %c3_28 = arith.constant 3 : index
      %c0_29 = arith.constant 0 : index
      %c0_30 = arith.constant 0 : index
      %54 = vector.load %arg3[%c0_27, %c3_28, %c0_29, %c0_30] : memref<1x4x8x256xf32, #tpu.memory_space<vmem>>, vector<1x1x8x256xf32>
      %55 = vector.shape_cast %54 : vector<1x1x8x256xf32> to vector<8x256xf32>
      %c0_31 = arith.constant 0 : index
      %c4 = arith.constant 4 : index
      %56 = vector.load %arg4[%c0_31, %c4] : memref<8x6xf32, #tpu.memory_space<vmem>>, vector<8x1xf32>
      %57 = vector.extract_strided_slice %55 {offsets = [0, 0], sizes = [8, 128], strides = [1, 1]} : vector<8x256xf32> to vector<8x128xf32>
      %58 = vector.broadcast %56 : vector<8x1xf32> to vector<8x128xf32>
      %59 = arith.mulf %58, %57 : vector<8x128xf32>
      %60 = arith.addf %53, %59 : vector<8x128xf32>
      %c0_32 = arith.constant 0 : index
      %c1_33 = arith.constant 1 : index
      %c0_34 = arith.constant 0 : index
      %c0_35 = arith.constant 0 : index
      %61 = vector.load %arg3[%c0_32, %c1_33, %c0_34, %c0_35] : memref<1x4x8x256xf32, #tpu.memory_space<vmem>>, vector<1x1x8x256xf32>
      %62 = vector.shape_cast %61 : vector<1x1x8x256xf32> to vector<8x256xf32>
      %c255_i32_36 = arith.constant 255 : i32
      %63 = tpu.dynamic_rotate %62 by %c255_i32_36 dim 1 : vector<8x256xf32>, i32 -> vector<8x256xf32>
      %c0_37 = arith.constant 0 : index
      %c5 = arith.constant 5 : index
      %64 = vector.load %arg4[%c0_37, %c5] : memref<8x6xf32, #tpu.memory_space<vmem>>, vector<8x1xf32>
      %65 = vector.extract_strided_slice %63 {offsets = [0, 0], sizes = [8, 128], strides = [1, 1]} : vector<8x256xf32> to vector<8x128xf32>
      %66 = vector.broadcast %64 : vector<8x1xf32> to vector<8x128xf32>
      %67 = arith.mulf %66, %65 : vector<8x128xf32>
      %68 = arith.addf %60, %67 : vector<8x128xf32>
      %69 = vector.broadcast %7 : vector<1x128xf32> to vector<8x128xf32>
      %70 = arith.mulf %68, %69 : vector<8x128xf32>
      %c0_38 = arith.constant 0 : index
      %c0_39 = arith.constant 0 : index
      %71 = vector.load %arg9[%c0_38, %c0_39] : memref<8x1xf32, #tpu.memory_space<vmem>>, vector<8x1xf32>
      %cst_40 = arith.constant dense<0.000000e+00> : vector<8xf32>
      %72 = vector.multi_reduction <add>, %70, %cst_40 [1] : vector<8x128xf32> to vector<8xf32>
      %73 = vector.shape_cast %72 : vector<8xf32> to vector<8x1xf32>
      %74 = arith.addf %71, %73 : vector<8x1xf32>
      %c0_41 = arith.constant 0 : index
      %c0_42 = arith.constant 0 : index
      %75 = vector.load %arg9[%c0_41, %c0_42] : memref<8x1xf32, #tpu.memory_space<vmem>>, vector<8x1xf32>
      tpu.vector_store %arg9[%c0_41, %c0_42], %74 {strides = array<i32>} : memref<8x1xf32, #tpu.memory_space<vmem>>, vector<8x1xf32>,
      %c0_43 = arith.constant 0 : index
      %c0_44 = arith.constant 0 : index
      %76 = vector.load %arg10[%c0_43, %c0_44] : memref<8x1xf32, #tpu.memory_space<vmem>>, vector<8x1xf32>
      %77 = arith.mulf %70, %70 : vector<8x128xf32>
      %cst_45 = arith.constant dense<0.000000e+00> : vector<8xf32>
      %78 = vector.multi_reduction <add>, %77, %cst_45 [1] : vector<8x128xf32> to vector<8xf32>
      %79 = vector.shape_cast %78 : vector<8xf32> to vector<8x1xf32>
      %80 = arith.addf %76, %79 : vector<8x1xf32>
      %c0_46 = arith.constant 0 : index
      %c0_47 = arith.constant 0 : index
      %81 = vector.load %arg10[%c0_46, %c0_47] : memref<8x1xf32, #tpu.memory_space<vmem>>, vector<8x1xf32>
      tpu.vector_store %arg10[%c0_46, %c0_47], %80 {strides = array<i32>} : memref<8x1xf32, #tpu.memory_space<vmem>>, vector<8x1xf32>,
    } else {
    }
    %c1_i32 = arith.constant 1 : i32
    %18 = arith.cmpi eq, %arg0, %c1_i32 : i32
    %19 = arith.extui %18 : i1 to i32
    %c0_i32_5 = arith.constant 0 : i32
    %20 = arith.cmpi ne, %19, %c0_i32_5 : i32
    scf.if %20 {
      %c0 = arith.constant 0 : index
      %c0_7 = arith.constant 0 : index
      %24 = vector.load %arg9[%c0, %c0_7] : memref<8x1xf32, #tpu.memory_space<vmem>>, vector<8x1xf32>
      %cst = arith.constant 6.250000e-02 : f32
      %25 = vector.broadcast %cst : f32 to vector<8x1xf32>
      %26 = arith.mulf %24, %25 : vector<8x1xf32>
      %c0_8 = arith.constant 0 : index
      %c0_9 = arith.constant 0 : index
      %27 = vector.load %arg10[%c0_8, %c0_9] : memref<8x1xf32, #tpu.memory_space<vmem>>, vector<8x1xf32>
      %cst_10 = arith.constant 6.250000e-02 : f32
      %28 = vector.broadcast %cst_10 : f32 to vector<8x1xf32>
      %29 = arith.mulf %27, %28 : vector<8x1xf32>
      %30 = arith.mulf %26, %26 : vector<8x1xf32>
      %31 = arith.subf %29, %30 : vector<8x1xf32>
      %cst_11 = arith.constant 0.000000e+00 : f32
      %32 = vector.broadcast %cst_11 : f32 to vector<8x1xf32>
      %33 = arith.maximumf %31, %32 : vector<8x1xf32>
      %c0_12 = arith.constant 0 : index
      %c1 = arith.constant 1 : index
      %34 = vector.load %arg6[%c0_12, %c1] : memref<8x8xf32, #tpu.memory_space<vmem>>, vector<8x1xf32>
      %cst_13 = arith.constant 9.99999974E-6 : f32
      %35 = vector.broadcast %cst_13 : f32 to vector<8x1xf32>
      %36 = arith.addf %33, %35 : vector<8x1xf32>
      %37 = math.rsqrt %36 : vector<8x1xf32>
      %38 = arith.mulf %34, %37 : vector<8x1xf32>
      %c0_14 = arith.constant 0 : index
      %c2 = arith.constant 2 : index
      %39 = vector.load %arg6[%c0_14, %c2] : memref<8x8xf32, #tpu.memory_space<vmem>>, vector<8x1xf32>
      %40 = arith.mulf %26, %38 : vector<8x1xf32>
      %41 = arith.subf %39, %40 : vector<8x1xf32>
      %cst_15 = arith.constant 0.000000e+00 : f32
      %42 = vector.broadcast %cst_15 : f32 to vector<8x128xf32>
      %c0_16 = arith.constant 0 : index
      %c0_17 = arith.constant 0 : index
      %c0_18 = arith.constant 0 : index
      %c0_19 = arith.constant 0 : index
      %43 = vector.load %arg3[%c0_16, %c0_17, %c0_18, %c0_19] : memref<1x4x8x256xf32, #tpu.memory_space<vmem>>, vector<1x1x8x256xf32>
      %44 = vector.shape_cast %43 : vector<1x1x8x256xf32> to vector<8x256xf32>
      %c0_20 = arith.constant 0 : index
      %c0_21 = arith.constant 0 : index
      %45 = vector.load %arg4[%c0_20, %c0_21] : memref<8x6xf32, #tpu.memory_space<vmem>>, vector<8x1xf32>
      %46 = vector.extract_strided_slice %44 {offsets = [0, 0], sizes = [8, 128], strides = [1, 1]} : vector<8x256xf32> to vector<8x128xf32>
      %47 = vector.broadcast %45 : vector<8x1xf32> to vector<8x128xf32>
      %48 = arith.mulf %47, %46 : vector<8x128xf32>
      %49 = arith.addf %42, %48 : vector<8x128xf32>
      %c0_22 = arith.constant 0 : index
      %c2_23 = arith.constant 2 : index
      %c0_24 = arith.constant 0 : index
      %c0_25 = arith.constant 0 : index
      %50 = vector.load %arg3[%c0_22, %c2_23, %c0_24, %c0_25] : memref<1x4x8x256xf32, #tpu.memory_space<vmem>>, vector<1x1x8x256xf32>
      %51 = vector.shape_cast %50 : vector<1x1x8x256xf32> to vector<8x256xf32>
      %c0_26 = arith.constant 0 : index
      %c1_27 = arith.constant 1 : index
      %52 = vector.load %arg4[%c0_26, %c1_27] : memref<8x6xf32, #tpu.memory_space<vmem>>, vector<8x1xf32>
      %53 = vector.extract_strided_slice %51 {offsets = [0, 0], sizes = [8, 128], strides = [1, 1]} : vector<8x256xf32> to vector<8x128xf32>
      %54 = vector.broadcast %52 : vector<8x1xf32> to vector<8x128xf32>
      %55 = arith.mulf %54, %53 : vector<8x128xf32>
      %56 = arith.addf %49, %55 : vector<8x128xf32>
      %c0_28 = arith.constant 0 : index
      %c0_29 = arith.constant 0 : index
      %c0_30 = arith.constant 0 : index
      %c0_31 = arith.constant 0 : index
      %57 = vector.load %arg3[%c0_28, %c0_29, %c0_30, %c0_31] : memref<1x4x8x256xf32, #tpu.memory_space<vmem>>, vector<1x1x8x256xf32>
      %58 = vector.shape_cast %57 : vector<1x1x8x256xf32> to vector<8x256xf32>
      %c255_i32 = arith.constant 255 : i32
      %59 = tpu.dynamic_rotate %58 by %c255_i32 dim 1 : vector<8x256xf32>, i32 -> vector<8x256xf32>
      %c0_32 = arith.constant 0 : index
      %c2_33 = arith.constant 2 : index
      %60 = vector.load %arg4[%c0_32, %c2_33] : memref<8x6xf32, #tpu.memory_space<vmem>>, vector<8x1xf32>
      %61 = vector.extract_strided_slice %59 {offsets = [0, 0], sizes = [8, 128], strides = [1, 1]} : vector<8x256xf32> to vector<8x128xf32>
      %62 = vector.broadcast %60 : vector<8x1xf32> to vector<8x128xf32>
      %63 = arith.mulf %62, %61 : vector<8x128xf32>
      %64 = arith.addf %56, %63 : vector<8x128xf32>
      %c0_34 = arith.constant 0 : index
      %c1_35 = arith.constant 1 : index
      %c0_36 = arith.constant 0 : index
      %c0_37 = arith.constant 0 : index
      %65 = vector.load %arg3[%c0_34, %c1_35, %c0_36, %c0_37] : memref<1x4x8x256xf32, #tpu.memory_space<vmem>>, vector<1x1x8x256xf32>
      %66 = vector.shape_cast %65 : vector<1x1x8x256xf32> to vector<8x256xf32>
      %c0_38 = arith.constant 0 : index
      %c3 = arith.constant 3 : index
      %67 = vector.load %arg4[%c0_38, %c3] : memref<8x6xf32, #tpu.memory_space<vmem>>, vector<8x1xf32>
      %68 = vector.extract_strided_slice %66 {offsets = [0, 0], sizes = [8, 128], strides = [1, 1]} : vector<8x256xf32> to vector<8x128xf32>
      %69 = vector.broadcast %67 : vector<8x1xf32> to vector<8x128xf32>
      %70 = arith.mulf %69, %68 : vector<8x128xf32>
      %71 = arith.addf %64, %70 : vector<8x128xf32>
      %c0_39 = arith.constant 0 : index
      %c3_40 = arith.constant 3 : index
      %c0_41 = arith.constant 0 : index
      %c0_42 = arith.constant 0 : index
      %72 = vector.load %arg3[%c0_39, %c3_40, %c0_41, %c0_42] : memref<1x4x8x256xf32, #tpu.memory_space<vmem>>, vector<1x1x8x256xf32>
      %73 = vector.shape_cast %72 : vector<1x1x8x256xf32> to vector<8x256xf32>
      %c0_43 = arith.constant 0 : index
      %c4 = arith.constant 4 : index
      %74 = vector.load %arg4[%c0_43, %c4] : memref<8x6xf32, #tpu.memory_space<vmem>>, vector<8x1xf32>
      %75 = vector.extract_strided_slice %73 {offsets = [0, 0], sizes = [8, 128], strides = [1, 1]} : vector<8x256xf32> to vector<8x128xf32>
      %76 = vector.broadcast %74 : vector<8x1xf32> to vector<8x128xf32>
      %77 = arith.mulf %76, %75 : vector<8x128xf32>
      %78 = arith.addf %71, %77 : vector<8x128xf32>
      %c0_44 = arith.constant 0 : index
      %c1_45 = arith.constant 1 : index
      %c0_46 = arith.constant 0 : index
      %c0_47 = arith.constant 0 : index
      %79 = vector.load %arg3[%c0_44, %c1_45, %c0_46, %c0_47] : memref<1x4x8x256xf32, #tpu.memory_space<vmem>>, vector<1x1x8x256xf32>
      %80 = vector.shape_cast %79 : vector<1x1x8x256xf32> to vector<8x256xf32>
      %c255_i32_48 = arith.constant 255 : i32
      %81 = tpu.dynamic_rotate %80 by %c255_i32_48 dim 1 : vector<8x256xf32>, i32 -> vector<8x256xf32>
      %c0_49 = arith.constant 0 : index
      %c5 = arith.constant 5 : index
      %82 = vector.load %arg4[%c0_49, %c5] : memref<8x6xf32, #tpu.memory_space<vmem>>, vector<8x1xf32>
      %83 = vector.extract_strided_slice %81 {offsets = [0, 0], sizes = [8, 128], strides = [1, 1]} : vector<8x256xf32> to vector<8x128xf32>
      %84 = vector.broadcast %82 : vector<8x1xf32> to vector<8x128xf32>
      %85 = arith.mulf %84, %83 : vector<8x128xf32>
      %86 = arith.addf %78, %85 : vector<8x128xf32>
      %87 = vector.broadcast %38 : vector<8x1xf32> to vector<8x128xf32>
      %88 = arith.mulf %86, %87 : vector<8x128xf32>
      %89 = vector.broadcast %41 : vector<8x1xf32> to vector<8x128xf32>
      %90 = arith.addf %88, %89 : vector<8x128xf32>
      %cst_50 = arith.constant 0.000000e+00 : f32
      %91 = vector.broadcast %cst_50 : f32 to vector<8x128xf32>
      %92 = arith.maximumf %90, %91 : vector<8x128xf32>
      %93 = vector.broadcast %7 : vector<1x128xf32> to vector<8x128xf32>
      %94 = arith.mulf %92, %93 : vector<8x128xf32>
      %c0_51 = arith.constant 0 : index
      %c0_52 = arith.constant 0 : index
      %95 = vector.load %arg5[%c0_51, %c0_52] : memref<8x8xbf16, #tpu.memory_space<vmem>>, vector<8x8xbf16>
      %96 = arith.truncf %94 : vector<8x128xf32> to vector<8x128xbf16>
      %cst_53 = arith.constant dense<0.000000e+00> : vector<8x128xf32>
      %97 = tpu.matmul %95, %96, %cst_53 {dimension_numbers = #tpu.dot_dimension_numbers<[1], [0], [0], [1], [0, 0, 1, 1], [], []>} : vector<8x8xbf16>, vector<8x128xbf16>, vector<8x128xf32> -> vector<8x128xf32>
      %c0_54 = arith.constant 0 : index
      %c0_55 = arith.constant 0 : index
      %98 = vector.load %arg11[%c0_54, %c0_55] : memref<8x1xf32, #tpu.memory_space<vmem>>, vector<8x1xf32>
      %cst_56 = arith.constant dense<0.000000e+00> : vector<8xf32>
      %99 = vector.multi_reduction <add>, %97, %cst_56 [1] : vector<8x128xf32> to vector<8xf32>
      %100 = vector.shape_cast %99 : vector<8xf32> to vector<8x1xf32>
      %101 = arith.addf %98, %100 : vector<8x1xf32>
      %c0_57 = arith.constant 0 : index
      %c0_58 = arith.constant 0 : index
      %102 = vector.load %arg11[%c0_57, %c0_58] : memref<8x1xf32, #tpu.memory_space<vmem>>, vector<8x1xf32>
      tpu.vector_store %arg11[%c0_57, %c0_58], %101 {strides = array<i32>} : memref<8x1xf32, #tpu.memory_space<vmem>>, vector<8x1xf32>,
      %c0_59 = arith.constant 0 : index
      %c0_60 = arith.constant 0 : index
      %103 = vector.load %arg12[%c0_59, %c0_60] : memref<8x1xf32, #tpu.memory_space<vmem>>, vector<8x1xf32>
      %104 = arith.mulf %97, %97 : vector<8x128xf32>
      %cst_61 = arith.constant dense<0.000000e+00> : vector<8xf32>
      %105 = vector.multi_reduction <add>, %104, %cst_61 [1] : vector<8x128xf32> to vector<8xf32>
      %106 = vector.shape_cast %105 : vector<8xf32> to vector<8x1xf32>
      %107 = arith.addf %103, %106 : vector<8x1xf32>
      %c0_62 = arith.constant 0 : index
      %c0_63 = arith.constant 0 : index
      %108 = vector.load %arg12[%c0_62, %c0_63] : memref<8x1xf32, #tpu.memory_space<vmem>>, vector<8x1xf32>
      tpu.vector_store %arg12[%c0_62, %c0_63], %107 {strides = array<i32>} : memref<8x1xf32, #tpu.memory_space<vmem>>, vector<8x1xf32>,
    } else {
    }
    %c2_i32 = arith.constant 2 : i32
    %21 = arith.cmpi eq, %arg0, %c2_i32 : i32
    %22 = arith.extui %21 : i1 to i32
    %c0_i32_6 = arith.constant 0 : i32
    %23 = arith.cmpi ne, %22, %c0_i32_6 : i32
    scf.if %23 {
      %c0 = arith.constant 0 : index
      %c0_7 = arith.constant 0 : index
      %24 = vector.load %arg9[%c0, %c0_7] : memref<8x1xf32, #tpu.memory_space<vmem>>, vector<8x1xf32>
      %cst = arith.constant 6.250000e-02 : f32
      %25 = vector.broadcast %cst : f32 to vector<8x1xf32>
      %26 = arith.mulf %24, %25 : vector<8x1xf32>
      %c0_8 = arith.constant 0 : index
      %c0_9 = arith.constant 0 : index
      %27 = vector.load %arg10[%c0_8, %c0_9] : memref<8x1xf32, #tpu.memory_space<vmem>>, vector<8x1xf32>
      %cst_10 = arith.constant 6.250000e-02 : f32
      %28 = vector.broadcast %cst_10 : f32 to vector<8x1xf32>
      %29 = arith.mulf %27, %28 : vector<8x1xf32>
      %30 = arith.mulf %26, %26 : vector<8x1xf32>
      %31 = arith.subf %29, %30 : vector<8x1xf32>
      %cst_11 = arith.constant 0.000000e+00 : f32
      %32 = vector.broadcast %cst_11 : f32 to vector<8x1xf32>
      %33 = arith.maximumf %31, %32 : vector<8x1xf32>
      %c0_12 = arith.constant 0 : index
      %c1 = arith.constant 1 : index
      %34 = vector.load %arg6[%c0_12, %c1] : memref<8x8xf32, #tpu.memory_space<vmem>>, vector<8x1xf32>
      %cst_13 = arith.constant 9.99999974E-6 : f32
      %35 = vector.broadcast %cst_13 : f32 to vector<8x1xf32>
      %36 = arith.addf %33, %35 : vector<8x1xf32>
      %37 = math.rsqrt %36 : vector<8x1xf32>
      %38 = arith.mulf %34, %37 : vector<8x1xf32>
      %c0_14 = arith.constant 0 : index
      %c2 = arith.constant 2 : index
      %39 = vector.load %arg6[%c0_14, %c2] : memref<8x8xf32, #tpu.memory_space<vmem>>, vector<8x1xf32>
      %40 = arith.mulf %26, %38 : vector<8x1xf32>
      %41 = arith.subf %39, %40 : vector<8x1xf32>
      %cst_15 = arith.constant 0.000000e+00 : f32
      %42 = vector.broadcast %cst_15 : f32 to vector<8x128xf32>
      %c0_16 = arith.constant 0 : index
      %c0_17 = arith.constant 0 : index
      %c0_18 = arith.constant 0 : index
      %c0_19 = arith.constant 0 : index
      %43 = vector.load %arg3[%c0_16, %c0_17, %c0_18, %c0_19] : memref<1x4x8x256xf32, #tpu.memory_space<vmem>>, vector<1x1x8x256xf32>
      %44 = vector.shape_cast %43 : vector<1x1x8x256xf32> to vector<8x256xf32>
      %c0_20 = arith.constant 0 : index
      %c0_21 = arith.constant 0 : index
      %45 = vector.load %arg4[%c0_20, %c0_21] : memref<8x6xf32, #tpu.memory_space<vmem>>, vector<8x1xf32>
      %46 = vector.extract_strided_slice %44 {offsets = [0, 0], sizes = [8, 128], strides = [1, 1]} : vector<8x256xf32> to vector<8x128xf32>
      %47 = vector.broadcast %45 : vector<8x1xf32> to vector<8x128xf32>
      %48 = arith.mulf %47, %46 : vector<8x128xf32>
      %49 = arith.addf %42, %48 : vector<8x128xf32>
      %c0_22 = arith.constant 0 : index
      %c2_23 = arith.constant 2 : index
      %c0_24 = arith.constant 0 : index
      %c0_25 = arith.constant 0 : index
      %50 = vector.load %arg3[%c0_22, %c2_23, %c0_24, %c0_25] : memref<1x4x8x256xf32, #tpu.memory_space<vmem>>, vector<1x1x8x256xf32>
      %51 = vector.shape_cast %50 : vector<1x1x8x256xf32> to vector<8x256xf32>
      %c0_26 = arith.constant 0 : index
      %c1_27 = arith.constant 1 : index
      %52 = vector.load %arg4[%c0_26, %c1_27] : memref<8x6xf32, #tpu.memory_space<vmem>>, vector<8x1xf32>
      %53 = vector.extract_strided_slice %51 {offsets = [0, 0], sizes = [8, 128], strides = [1, 1]} : vector<8x256xf32> to vector<8x128xf32>
      %54 = vector.broadcast %52 : vector<8x1xf32> to vector<8x128xf32>
      %55 = arith.mulf %54, %53 : vector<8x128xf32>
      %56 = arith.addf %49, %55 : vector<8x128xf32>
      %c0_28 = arith.constant 0 : index
      %c0_29 = arith.constant 0 : index
      %c0_30 = arith.constant 0 : index
      %c0_31 = arith.constant 0 : index
      %57 = vector.load %arg3[%c0_28, %c0_29, %c0_30, %c0_31] : memref<1x4x8x256xf32, #tpu.memory_space<vmem>>, vector<1x1x8x256xf32>
      %58 = vector.shape_cast %57 : vector<1x1x8x256xf32> to vector<8x256xf32>
      %c255_i32 = arith.constant 255 : i32
      %59 = tpu.dynamic_rotate %58 by %c255_i32 dim 1 : vector<8x256xf32>, i32 -> vector<8x256xf32>
      %c0_32 = arith.constant 0 : index
      %c2_33 = arith.constant 2 : index
      %60 = vector.load %arg4[%c0_32, %c2_33] : memref<8x6xf32, #tpu.memory_space<vmem>>, vector<8x1xf32>
      %61 = vector.extract_strided_slice %59 {offsets = [0, 0], sizes = [8, 128], strides = [1, 1]} : vector<8x256xf32> to vector<8x128xf32>
      %62 = vector.broadcast %60 : vector<8x1xf32> to vector<8x128xf32>
      %63 = arith.mulf %62, %61 : vector<8x128xf32>
      %64 = arith.addf %56, %63 : vector<8x128xf32>
      %c0_34 = arith.constant 0 : index
      %c1_35 = arith.constant 1 : index
      %c0_36 = arith.constant 0 : index
      %c0_37 = arith.constant 0 : index
      %65 = vector.load %arg3[%c0_34, %c1_35, %c0_36, %c0_37] : memref<1x4x8x256xf32, #tpu.memory_space<vmem>>, vector<1x1x8x256xf32>
      %66 = vector.shape_cast %65 : vector<1x1x8x256xf32> to vector<8x256xf32>
      %c0_38 = arith.constant 0 : index
      %c3 = arith.constant 3 : index
      %67 = vector.load %arg4[%c0_38, %c3] : memref<8x6xf32, #tpu.memory_space<vmem>>, vector<8x1xf32>
      %68 = vector.extract_strided_slice %66 {offsets = [0, 0], sizes = [8, 128], strides = [1, 1]} : vector<8x256xf32> to vector<8x128xf32>
      %69 = vector.broadcast %67 : vector<8x1xf32> to vector<8x128xf32>
      %70 = arith.mulf %69, %68 : vector<8x128xf32>
      %71 = arith.addf %64, %70 : vector<8x128xf32>
      %c0_39 = arith.constant 0 : index
      %c3_40 = arith.constant 3 : index
      %c0_41 = arith.constant 0 : index
      %c0_42 = arith.constant 0 : index
      %72 = vector.load %arg3[%c0_39, %c3_40, %c0_41, %c0_42] : memref<1x4x8x256xf32, #tpu.memory_space<vmem>>, vector<1x1x8x256xf32>
      %73 = vector.shape_cast %72 : vector<1x1x8x256xf32> to vector<8x256xf32>
      %c0_43 = arith.constant 0 : index
      %c4 = arith.constant 4 : index
      %74 = vector.load %arg4[%c0_43, %c4] : memref<8x6xf32, #tpu.memory_space<vmem>>, vector<8x1xf32>
      %75 = vector.extract_strided_slice %73 {offsets = [0, 0], sizes = [8, 128], strides = [1, 1]} : vector<8x256xf32> to vector<8x128xf32>
      %76 = vector.broadcast %74 : vector<8x1xf32> to vector<8x128xf32>
      %77 = arith.mulf %76, %75 : vector<8x128xf32>
      %78 = arith.addf %71, %77 : vector<8x128xf32>
      %c0_44 = arith.constant 0 : index
      %c1_45 = arith.constant 1 : index
      %c0_46 = arith.constant 0 : index
      %c0_47 = arith.constant 0 : index
      %79 = vector.load %arg3[%c0_44, %c1_45, %c0_46, %c0_47] : memref<1x4x8x256xf32, #tpu.memory_space<vmem>>, vector<1x1x8x256xf32>
      %80 = vector.shape_cast %79 : vector<1x1x8x256xf32> to vector<8x256xf32>
      %c255_i32_48 = arith.constant 255 : i32
      %81 = tpu.dynamic_rotate %80 by %c255_i32_48 dim 1 : vector<8x256xf32>, i32 -> vector<8x256xf32>
      %c0_49 = arith.constant 0 : index
      %c5 = arith.constant 5 : index
      %82 = vector.load %arg4[%c0_49, %c5] : memref<8x6xf32, #tpu.memory_space<vmem>>, vector<8x1xf32>
      %83 = vector.extract_strided_slice %81 {offsets = [0, 0], sizes = [8, 128], strides = [1, 1]} : vector<8x256xf32> to vector<8x128xf32>
      %84 = vector.broadcast %82 : vector<8x1xf32> to vector<8x128xf32>
      %85 = arith.mulf %84, %83 : vector<8x128xf32>
      %86 = arith.addf %78, %85 : vector<8x128xf32>
      %87 = vector.broadcast %38 : vector<8x1xf32> to vector<8x128xf32>
      %88 = arith.mulf %86, %87 : vector<8x128xf32>
      %89 = vector.broadcast %41 : vector<8x1xf32> to vector<8x128xf32>
      %90 = arith.addf %88, %89 : vector<8x128xf32>
      %cst_50 = arith.constant 0.000000e+00 : f32
      %91 = vector.broadcast %cst_50 : f32 to vector<8x128xf32>
      %92 = arith.maximumf %90, %91 : vector<8x128xf32>
      %93 = vector.broadcast %7 : vector<1x128xf32> to vector<8x128xf32>
      %94 = arith.mulf %92, %93 : vector<8x128xf32>
      %c0_51 = arith.constant 0 : index
      %c0_52 = arith.constant 0 : index
      %95 = vector.load %arg5[%c0_51, %c0_52] : memref<8x8xbf16, #tpu.memory_space<vmem>>, vector<8x8xbf16>
      %96 = arith.truncf %94 : vector<8x128xf32> to vector<8x128xbf16>
      %cst_53 = arith.constant dense<0.000000e+00> : vector<8x128xf32>
      %97 = tpu.matmul %95, %96, %cst_53 {dimension_numbers = #tpu.dot_dimension_numbers<[1], [0], [0], [1], [0, 0, 1, 1], [], []>} : vector<8x8xbf16>, vector<8x128xbf16>, vector<8x128xf32> -> vector<8x128xf32>
      %c0_54 = arith.constant 0 : index
      %c0_55 = arith.constant 0 : index
      %98 = vector.load %arg11[%c0_54, %c0_55] : memref<8x1xf32, #tpu.memory_space<vmem>>, vector<8x1xf32>
      %cst_56 = arith.constant 6.250000e-02 : f32
      %99 = vector.broadcast %cst_56 : f32 to vector<8x1xf32>
      %100 = arith.mulf %98, %99 : vector<8x1xf32>
      %c0_57 = arith.constant 0 : index
      %c0_58 = arith.constant 0 : index
      %101 = vector.load %arg12[%c0_57, %c0_58] : memref<8x1xf32, #tpu.memory_space<vmem>>, vector<8x1xf32>
      %cst_59 = arith.constant 6.250000e-02 : f32
      %102 = vector.broadcast %cst_59 : f32 to vector<8x1xf32>
      %103 = arith.mulf %101, %102 : vector<8x1xf32>
      %104 = arith.mulf %100, %100 : vector<8x1xf32>
      %105 = arith.subf %103, %104 : vector<8x1xf32>
      %cst_60 = arith.constant 0.000000e+00 : f32
      %106 = vector.broadcast %cst_60 : f32 to vector<8x1xf32>
      %107 = arith.maximumf %105, %106 : vector<8x1xf32>
      %c0_61 = arith.constant 0 : index
      %c1_62 = arith.constant 1 : index
      %108 = vector.load %arg7[%c0_61, %c1_62] : memref<8x8xf32, #tpu.memory_space<vmem>>, vector<8x1xf32>
      %cst_63 = arith.constant 9.99999974E-6 : f32
      %109 = vector.broadcast %cst_63 : f32 to vector<8x1xf32>
      %110 = arith.addf %107, %109 : vector<8x1xf32>
      %111 = math.rsqrt %110 : vector<8x1xf32>
      %112 = arith.mulf %108, %111 : vector<8x1xf32>
      %c0_64 = arith.constant 0 : index
      %c2_65 = arith.constant 2 : index
      %113 = vector.load %arg7[%c0_64, %c2_65] : memref<8x8xf32, #tpu.memory_space<vmem>>, vector<8x1xf32>
      %114 = arith.mulf %100, %112 : vector<8x1xf32>
      %115 = arith.subf %113, %114 : vector<8x1xf32>
      %116 = vector.broadcast %112 : vector<8x1xf32> to vector<8x128xf32>
      %117 = arith.mulf %97, %116 : vector<8x128xf32>
      %118 = vector.broadcast %115 : vector<8x1xf32> to vector<8x128xf32>
      %119 = arith.addf %117, %118 : vector<8x128xf32>
      %120 = vector.broadcast %7 : vector<1x128xf32> to vector<8x128xf32>
      %121 = arith.mulf %119, %120 : vector<8x128xf32>
      %c0_66 = arith.constant 0 : index
      %c0_67 = arith.constant 0 : index
      %c0_68 = arith.constant 0 : index
      %122 = vector.load %arg8[%c0_66, %c0_67, %c0_68] : memref<1x8x128xf32, #tpu.memory_space<vmem>>, vector<1x8x128xf32>
      %123 = vector.shape_cast %122 : vector<1x8x128xf32> to vector<8x128xf32>
      %124 = vector.shape_cast %121 : vector<8x128xf32> to vector<1x8x128xf32>
      tpu.vector_store %arg8[%c0_66, %c0_67, %c0_68], %124 {strides = array<i32>} : memref<1x8x128xf32, #tpu.memory_space<vmem>>, vector<1x8x128xf32>,
    } else {
    }
    return
  }
  func.func @transform_0(%arg0: i32, %arg1: i32, %arg2: i32) -> (i32, i32, i32, i32) {
    %c1_i32 = arith.constant 1 : i32
    %0 = arith.muli %arg1, %c1_i32 : i32
    %1 = arith.addi %0, %arg2 : i32
    %c0_i32 = arith.constant 0 : i32
    %c0_i32_0 = arith.constant 0 : i32
    %c0_i32_1 = arith.constant 0 : i32
    %c0_i32_2 = arith.constant 0 : i32
    return %1, %c0_i32, %c0_i32_0, %c0_i32_1 : i32, i32, i32, i32
  }
  func.func @transform_1(%arg0: i32, %arg1: i32, %arg2: i32) -> (i32, i32) {
    %c0_i32 = arith.constant 0 : i32
    %c0_i32_0 = arith.constant 0 : i32
    %c0_i32_1 = arith.constant 0 : i32
    return %c0_i32, %c0_i32_0 : i32, i32
  }
  func.func @transform_2(%arg0: i32, %arg1: i32, %arg2: i32) -> (i32, i32) {
    %c0_i32 = arith.constant 0 : i32
    %c0_i32_0 = arith.constant 0 : i32
    %c0_i32_1 = arith.constant 0 : i32
    return %c0_i32, %c0_i32_0 : i32, i32
  }
  func.func @transform_3(%arg0: i32, %arg1: i32, %arg2: i32) -> (i32, i32) {
    %c0_i32 = arith.constant 0 : i32
    %c0_i32_0 = arith.constant 0 : i32
    %c0_i32_1 = arith.constant 0 : i32
    return %c0_i32, %c0_i32_0 : i32, i32
  }
  func.func @transform_4(%arg0: i32, %arg1: i32, %arg2: i32) -> (i32, i32) {
    %c0_i32 = arith.constant 0 : i32
    %c0_i32_0 = arith.constant 0 : i32
    %c0_i32_1 = arith.constant 0 : i32
    return %c0_i32, %c0_i32_0 : i32, i32
  }
  func.func @transform_5(%arg0: i32, %arg1: i32, %arg2: i32) -> (i32, i32, i32) {
    %c2_i32 = arith.constant 2 : i32
    %0 = arith.cmpi eq, %arg0, %c2_i32 : i32
    %c0_i32 = arith.constant 0 : i32
    %1 = arith.select %0, %arg1, %c0_i32 : i32
    %c2_i32_0 = arith.constant 2 : i32
    %2 = arith.cmpi eq, %arg0, %c2_i32_0 : i32
    %c0_i32_1 = arith.constant 0 : i32
    %3 = arith.select %2, %arg2, %c0_i32_1 : i32
    %c0_i32_2 = arith.constant 0 : i32
    %c0_i32_3 = arith.constant 0 : i32
    return %1, %c0_i32_2, %3 : i32, i32, i32
  }
}

</mosaic_0001>

<bundles_post_ra>
// kernel: sepconv_forward.1
= control target key start
LH: loop header
LB: loop body
LE: loop exit
PB: predicated region body
PF: predicated region fallthrough
CT: control target
= control target key end

     0   :  { %s1056_s18 = smov 0   ;;  %s1058_s19 = smov 0   ;;  %s1200_s0 = inlined_call_operand.vmem [shape: f32[2,4,8,256], index: 0, kind: input, shape index: {}]   ;;  %s1201_s1 = inlined_call_operand.vmem [shape: f32[8,6], index: 1, kind: input, shape index: {}]   ;;  %s1202_s2 = inlined_call_operand.vmem [shape: bf16[8,8], index: 2, kind: input, shape index: {}]   ;;  %s1203_s3 = inlined_call_operand.vmem [shape: f32[8,8], index: 3, kind: input, shape index: {}]   ;;  %s1204_s4 = inlined_call_operand.vmem [shape: f32[8,8], index: 4, kind: input, shape index: {}]   ;;  %s1205_s5 = inlined_call_operand.vmem [shape: f32[2,8,128], index: 5, kind: output, shape index: {}]  }
   0x1   :  { %s1060_s20 = smov 0   ;;  %s1062_s21 = smov 0  }
   0x2   :  { %s1064_s22 = smov 0  }
   0x3 LB: > { %s30_s23 = sadd.s32 1, %s985_s20  ;;  %s34_s24 = sadd.s32 1, %s989_s21  ;;  %s993_s22 = sphi %s1064_s22, %s15_s22   ;;  %s989_s21 = sphi %s1062_s21, %s1209_s21   ;;  %s985_s20 = sphi %s1060_s20, %s1208_s20   ;;  %s981_s19 = sphi %s1058_s19, %s1207_s19   ;;  %s977_s18 = sphi %s1056_s18, %s1206_s18  }
   0x4   : > { %p32_p0 = scmp.ge.s32.totalorder %s30_s23, 2  ;;  %p810_p1 = scmp.ge.s32.totalorder %s993_s22, 1 }
   0x5   : > { %p218_p2 = scmp.lt.s32.totalorder %s993_s22, 7 }
   0x6   : > { %s1211_s23 = smov (%p32_p0, %s30_s23), 0  ;;  %s1213_s24 = smov (!%p32_p0, %s34_s24), %s989_s21 }
   0x7   : > { %p219_p3 = pnand %p810_p1, %p218_p2  ;;  %p36_p4 = scmp.ge.s32.totalorder %s1213_s24, 3 }
   0x8   : > { %p253_p5 = scmp.lt.s32.totalorder (!%p219_p3), %s977_s18, 1  ;;  %p259_p6 = scmp.eq.s32.totalorder (!%p219_p3), %s981_s19, 2  ;;  %v273_v0 = vlaneseq (!%p219_p3)  ;;  %v995_v2 = vmov (!%p219_p3), 0.0  }
   0x9   : > { %s1215_s24 = smov (%p36_p4, %s1213_s24), 0  ;;  %222 = sbr.rel (%p219_p3) target bundleno = 1965 (0x7ad), region = 40 }
   0xa   : > { %p281_p7 = scmp.eq.s32.totalorder (!%p219_p3), %s981_s19, 0  ;;  %p282_p8 = scmp.eq.s32.totalorder (!%p219_p3), %s977_s18, 0  ;;  %v1090_v1 = vand.u32 (!%p219_p3), 127, %v273_v0 }
   0xc   : > { %vm278_vm0 = vcmp.lt.s32.totalorder (!%p219_p3), %v1090_v1, 8  ;;  %p286_p9 = pnand (!%p219_p3), %p282_p8, %p281_p7 }
   0xd   : > { %v1098_v3 = vsel (!%p219_p3), %vm278_vm0, 1.0, %v995_v2 }
  0x10   : > { %s254_s25 = scalar_select %p253_p5, %s977_s18, 1 }
  0x11   : > { %s1217_s18 = smov (!%p259_p6, %s977_s18), 0  ;;  %289 = sbr.rel (%p286_p9) target bundleno = 24 (0x18), region = 44 }
  0x12   : > { %s835_s26 = sshll.u32 %s254_s25, 6  ;;  %p262_p10 = scmp.lt.s32.totalorder %s1217_s18, 1  ;;  %vm290_vm1 = vcmask (!%p286_p9), 7168   ;;  %v996_v4 = vmov (!%p286_p9), 0.0  }
  0x13   : > { %s1096_s29 = scalar_lea.vmem %s1200_s0, %s835_s26  ;;  %291 = vst.msk [vmem:[#allocation2] sm:$0xff] (!%p286_p9), %vm290_vm1, %v996_v4  ;;  %292 = vst.msk [vmem:[#allocation3] sm:$0xff] (!%p286_p9), %vm290_vm1, %v996_v4 }
  0x14   : > { %s1219_s18 = smov (!%p262_p10, %s1217_s18), 1  ;;  %293 = vst.msk [vmem:[#allocation4] sm:$0xff] (!%p286_p9), %vm290_vm1, %v996_v4  ;;  %294 = vst.msk [vmem:[#allocation5] sm:$0xff] (!%p286_p9), %vm290_vm1, %v996_v4 }
  0x15   : > { %s813_s30 = sshll.u32 %s1219_s18, 3 }
  0x16   : > { %s1103_s8 = scalar_lea.vmem %s1205_s5, %s813_s30 }
  0x18 PF: > { %p816_p11 = scmp.ne.s32.totalorder %s981_s19, 0 }
  0x19   : > { %v300_v5 = vld [vmem:[%s1201_s1] sm:$0xff] (!%p816_p11)  ;;  %v997_v6 = vmov (!%p816_p11), 2   ;;  %v998_v7 = vmov (!%p816_p11), 0   ;;  %v999_v8 = vmov (!%p816_p11), 3   ;;  %v1000_v9 = vmov (!%p816_p11), 1   ;;  %s1002_s11 = smov (!%p816_p11), 127  }
  0x1a   : > { %297 = sbr.rel (%p816_p11) target bundleno = 331 (0x14b), region = 48  ;;  %926 = vset.pattern.permute.xlu1 (!%p816_p11), %v997_v6  ;;  %924 = vset.pattern.permute.xlu0 (!%p816_p11), %v998_v7  ;;  %v298_v10 = vld [vmem:[%s1096_s29] sm:$0xff] (!%p816_p11)  ;;  %v1001_v11 = vmov (!%p816_p11), 4   ;;  %v1003_v12 = vmov (!%p816_p11), 5   ;;  %v299_v13 = vld [vmem:[%s1096_s29 + $0x8] sm:$0xff] (!%p816_p11)  ;;  %v818_v14 = vld [vmem:[%s1096_s29 + $0x10] sm:$0xff] (!%p816_p11) }
  0x1b   : > { %323 = vperm.xlu1 (!%p816_p11), %926, %v300_v5   ;;  %303 = vperm.xlu0 (!%p816_p11), %924, %v300_v5   ;;  %v819_v15 = vld [vmem:[%s1096_s29 + $0x18] sm:$0xff] (!%p816_p11)  ;;  %v817_v20 = vld [vmem:[%s1096_s29 + $0x20] sm:$0xff] (!%p816_p11)  ;;  %vm320_vm2 = vcmp.lt.s32.totalorder (!%p816_p11), %v1090_v1, 127  ;;  %v820_v32 = vld [vmem:[%s1096_s29 + $0x30] sm:$0xff] (!%p816_p11)  ;;  %vm361_vm3 = vcmask (!%p816_p11), 7168  }
  0x1c   : > { %v357_v43 = vld [vmem:[#allocation2] sm:$0xff] (!%p816_p11)  ;;  %v363_v45 = vld [vmem:[#allocation3] sm:$0xff] (!%p816_p11) }
  0x1f   : > { %927 = vset.pattern.permute.xlu1 (!%p816_p11), %v999_v8  ;;  %925 = vset.pattern.permute.xlu0 (!%p816_p11), %v1000_v9 }
  0x20   : > { %332 = vperm.xlu1 (!%p816_p11), %927, %v300_v5   ;;  %311 = vperm.xlu0 (!%p816_p11), %925, %v300_v5  }
  0x24   : > { %928 = vset.pattern.permute.xlu1 %v1001_v11  ;;  %316 = vrot.lane.b32.xlu0 %v298_v10, %s1002_s11 }
  0x25   : > { %340 = vperm.xlu1 %928, %v300_v5   ;;  %929 = vset.pattern.permute.xlu0 %v1003_v12 }
  0x28   : > { %351 = vperm.xlu0 %929, %v300_v5  }
  0x29   : > { %318 = vrot.lane.b32.xlu1 %v299_v13, %s1002_s11 }
  0x2d   : > { %345 = vrot.lane.b32.xlu1 %v818_v14, %s1002_s11 }
  0x31   : > { %347 = vrot.lane.b32.xlu1 %v819_v15, %s1002_s11 }
  0x9a   : > { %v324_v16 = vpop.permute.xlu1 %323  ;;  %v304_v17 = vpop.permute.xlu0 %303 }
  0x9b   : > { %v306_v22 = vmul.f32 %v304_v17, %v298_v10 }
  0x9f   : > { %v333_v18 = vpop.permute.xlu1 %332  ;;  %v312_v19 = vpop.permute.xlu0 %311 }
  0xa0   : > { %v314_v23 = vmul.f32 %v817_v20, %v312_v19  ;;  %v335_v29 = vmul.f32 %v818_v14, %v333_v18 }
  0xa2   : > { %v315_v27 = vadd.f32 %v314_v23, %v306_v22 }
  0xa3   : > { %v317_v24 = vpop.permute.xlu0 %316 }
  0xa4   : > { %v341_v21 = vpop.permute.xlu1 %340 }
  0xa5   : > { %v343_v35 = vmul.f32 %v820_v32, %v341_v21 }
  0xa7   : > { %v352_v34 = vpop.permute.xlu0 %351 }
  0xa8   : > { %v319_v25 = vpop.permute.xlu1 %318 }
  0xa9   : > { %v321_v26 = vsel %vm320_vm2, %v317_v24, %v319_v25 }
  0xaa   : > { %v326_v28 = vmul.f32 %v324_v16, %v321_v26 }
  0xac   : > { %v327_v30 = vadd.f32 %v326_v28, %v315_v27  ;;  %v346_v31 = vpop.permute.xlu1 %345 }
  0xae   : > { %v336_v33 = vadd.f32 %v335_v29, %v327_v30 }
  0xb0   : > { %v348_v36 = vpop.permute.xlu1 %347  ;;  %v344_v39 = vadd.f32 %v343_v35, %v336_v33 }
  0xb1   : > { %v349_v37 = vsel %vm320_vm2, %v346_v31, %v348_v36 }
  0xb2   : > { %v354_v38 = vmul.f32 %v352_v34, %v349_v37 }
  0xb4   : > { %v355_v40 = vadd.f32 %v354_v38, %v344_v39 }
  0xb6   : > { %v356_v41 = vmul.f32 %v1098_v3, %v355_v40 }
  0xb8   : > { %358 = vadd.xlane.f32.xlu0 %v356_v41  ;;  %v364_v42 = vmul.f32 %v356_v41, %v356_v41 }
  0xba   : > { %365 = vadd.xlane.f32.xlu1 %v364_v42 }
 0x145   : > { %v359_v44 = vpop.xlane.xlu0 %358 }
 0x146   : > { %v360_v46 = vadd.f32 %v359_v44, %v357_v43 }
 0x147   : > { %v366_v47 = vpop.xlane.xlu1 %365 }
 0x148   : > { %362 = vst.msk [vmem:[#allocation2] sm:$0xff] %vm361_vm3, %v360_v46  ;;  %v367_v48 = vadd.f32 %v366_v47, %v363_v45 }
 0x14a   : > { %368 = vst.msk [vmem:[#allocation3] sm:$0xff] %vm361_vm3, %v367_v48 }
 0x14b PF: > { %p821_p12 = scmp.ne.s32.totalorder %s981_s19, 1 }
 0x14c   : > { %s1004_s12 = smov (!%p821_p12), 1   ;;  %v1005_v58 = vmov (!%p821_p12), 0   ;;  %v380_v59 = vld [vmem:[%s1203_s3] sm:$0xff] (!%p821_p12)  ;;  %s1006_s15 = smov (!%p821_p12), 127   ;;  %v1007_v63 = vmov (!%p821_p12), 1   ;;  %v1008_v0 = vmov (!%p821_p12), 4  }
 0x14d   : > { %372 = sbr.rel (%p821_p12) target bundleno = 1207 (0x4b7), region = 52  ;;  %930 = vset.pattern.permute.xlu1 (!%p821_p12), %v1005_v58  ;;  %v400_v62 = vld [vmem:[%s1201_s1] sm:$0xff] (!%p821_p12)  ;;  %931 = vset.pattern.permute.xlu0 (!%p821_p12), %v1007_v63  ;;  %v1009_v2 = vmov (!%p821_p12), 5   ;;  %v824_v4 = vld [vmem:[%s1096_s29 + $0x18] sm:$0xff] (!%p821_p12)  ;;  %v1010_v5 = vmov (!%p821_p12), 2   ;;  %s1011_s18 = smov (!%p821_p12), 2  }
 0x14e   : > { %v1012_v8 = vmov (!%p821_p12), 3   ;;  %v398_v9 = vld [vmem:[%s1096_s29] sm:$0xff] (!%p821_p12)  ;;  %v399_v10 = vld [vmem:[%s1096_s29 + $0x8] sm:$0xff] (!%p821_p12)  ;;  %v823_v11 = vld [vmem:[%s1096_s29 + $0x10] sm:$0xff] (!%p821_p12)  ;;  %v1013_v14 = vmov (!%p821_p12), 0.0   ;;  %vm1014_vm4 = vmmov (!%p821_p12), 0  }
 0x14f   : > { %v373_v49 = vld [vmem:[#allocation2] sm:$0xff] (!%p821_p12)  ;;  %841 = vmatprep.subr.bf16.mxu0 (!%p821_p12), %v1013_v14  ;;  %843 = vmatprep.mubr.msk.bf16.mxu0 (!%p821_p12), %vm1014_vm4, %v1013_v14  ;;  %vm420_vm5 = vcmp.lt.s32.totalorder (!%p821_p12), %v1090_v1, 127  ;;  %v825_v32 = vld [vmem:[%s1096_s29 + $0x30] sm:$0xff] (!%p821_p12)  ;;  %vm475_vm6 = vcmask (!%p821_p12), 1043456   ;;  %vm471_vm7 = vcmask (!%p821_p12), 64512   ;;  %vm523_vm8 = vcmask (!%p821_p12), 7168  }
 0x150   : > { %v374_v51 = vmul.f32 (!%p821_p12), 0.0625, %v373_v49  ;;  %v822_v20 = vld [vmem:[%s1096_s29 + $0x20] sm:$0xff] (!%p821_p12) }
 0x151   : > { %v375_v50 = vld [vmem:[#allocation3] sm:$0xff] (!%p821_p12)  ;;  %v469_v48 = vld [vmem:[%s1202_s2] sm:$0xf] (!%p821_p12) }
 0x152   : > { %v376_v52 = vmul.f32 (!%p821_p12), 0.0625, %v375_v50  ;;  %v377_v53 = vmul.f32 (!%p821_p12), %v374_v51, %v374_v51 }
 0x154   : > { %v378_v54 = vsub.f32 %v376_v52, %v377_v53 }
 0x156   : > { %v379_v55 = vmax.f32 %v378_v54, 0.0  ;;  %v519_v54 = vld [vmem:[#allocation4] sm:$0xff] }
 0x158   : > { %v381_v56 = vadd.f32 1e-05, %v379_v55 }
 0x15a   : > { %939 = vrsqrt.f32 %v381_v56  ;;  %v525_v56 = vld [vmem:[#allocation5] sm:$0xff] }
 0x164   : > { %v940_v57 = vpop.eup %939 }
 0x165   : > { %384 = vrot.lane.b32.xlu0 %v940_v57, %s1004_s12 }
 0x1d7   : > { %v385_v60 = vpop.permute.xlu0 %384 }
 0x1d8   : > { %v387_v61 = vmul.f32 %v385_v60, %v380_v59 }
 0x1da   : > { %389 = vrot.lane.b32.xlu0 %v387_v61, %s1006_s15 }
 0x1de   : > { %411 = vperm.xlu0 %931, %v400_v62  }
 0x1e2   : > { %934 = vset.pattern.permute.xlu0 %v1008_v0 }
 0x1e3   : > { %440 = vperm.xlu0 %934, %v400_v62  }
 0x1e7   : > { %935 = vset.pattern.permute.xlu0 %v1009_v2 }
 0x1e8   : > { %451 = vperm.xlu0 %935, %v400_v62  }
 0x1ec   : > { %447 = vrot.lane.b32.xlu0 %v824_v4, %s1006_s15 }
 0x1ed   : > { %938 = vset.pattern.permute.xlu0 %v1010_v5 }
 0x24c   : > { %v390_v6 = vpop.permute.xlu0 %389 }
 0x24d   : > { %v392_v7 = vmul.f32 %v390_v6, %v374_v51 }
 0x24f   : > { %394 = vrot.lane.b32.xlu1 %v392_v7, %s1011_s18 }
 0x253   : > { %403 = vperm.xlu1 %930, %v400_v62  }
 0x257   : > { %932 = vset.pattern.permute.xlu1 %v1010_v5 }
 0x258   : > { %423 = vperm.xlu1 %932, %v400_v62  }
 0x25c   : > { %933 = vset.pattern.permute.xlu1 %v1012_v8 }
 0x25d   : > { %432 = vperm.xlu1 %933, %v400_v62   ;;  %v412_v19 = vpop.permute.xlu0 %411 }
 0x25e   : > { %v414_v24 = vmul.f32 %v822_v20, %v412_v19 }
 0x261   : > { %416 = vrot.lane.b32.xlu1 %v398_v9, %s1006_s15 }
 0x262   : > { %936 = vset.pattern.permute.xlu1 %v1007_v63  ;;  %v441_v22 = vpop.permute.xlu0 %440 }
 0x263   : > { %v443_v36 = vmul.f32 %v825_v32, %v441_v22 }
 0x265   : > { %418 = vrot.lane.b32.xlu1 %v399_v10, %s1006_s15 }
 0x267   : > { %v452_v29 = vpop.permute.xlu0 %451 }
 0x269   : > { %457 = vperm.xlu1 %936, %v387_v61  }
 0x26b   : > { %v448_v34 = vpop.permute.xlu0 %447 }
 0x26d   : > { %445 = vrot.lane.b32.xlu1 %v823_v11, %s1006_s15 }
 0x26e   : > { %937 = vset.pattern.permute.xlu1 %v1010_v5 }
 0x2c1   : > { %v395_v12 = vpop.permute.xlu1 %394 }
 0x2c2   : > { %v397_v13 = vsub.f32 %v380_v59, %v395_v12 }
 0x2c4   : > { %463 = vperm.xlu1 %937, %v397_v13  }
 0x2d2   : > { %v404_v15 = vpop.permute.xlu1 %403 }
 0x2d3   : > { %v406_v23 = vmul.f32 %v404_v15, %v398_v9 }
 0x2d5   : > { %v415_v26 = vadd.f32 %v414_v24, %v406_v23 }
 0x2d7   : > { %v424_v16 = vpop.permute.xlu1 %423 }
 0x2dc   : > { %v433_v17 = vpop.permute.xlu1 %432 }
 0x2dd   : > { %v435_v30 = vmul.f32 %v823_v11, %v433_v17 }
 0x2e0   : > { %v417_v18 = vpop.permute.xlu1 %416 }
 0x2e4   : > { %v419_v21 = vpop.permute.xlu1 %418 }
 0x2e5   : > { %v421_v25 = vsel %vm420_vm5, %v417_v18, %v419_v21 }
 0x2e6   : > { %v426_v27 = vmul.f32 %v424_v16, %v421_v25 }
 0x2e8   : > { %v458_v28 = vpop.permute.xlu1 %457  ;;  %v427_v31 = vadd.f32 %v426_v27, %v415_v26 }
 0x2ea   : > { %v436_v35 = vadd.f32 %v435_v30, %v427_v31 }
 0x2ec   : > { %v446_v33 = vpop.permute.xlu1 %445  ;;  %v444_v38 = vadd.f32 %v443_v36, %v436_v35 }
 0x2ed   : > { %v449_v37 = vsel %vm420_vm5, %v446_v33, %v448_v34 }
 0x2ee   : > { %v454_v39 = vmul.f32 %v452_v29, %v449_v37 }
 0x2f0   : > { %v455_v40 = vadd.f32 %v454_v39, %v444_v38 }
 0x2f2   : > { %v460_v41 = vmul.f32 %v458_v28, %v455_v40 }
 0x343   : > { %v464_v42 = vpop.permute.xlu1 %463 }
 0x344   : > { %v466_v43 = vadd.f32 %v464_v42, %v460_v41 }
 0x346   : > { %v467_v44 = vmax.f32 %v466_v43, 0.0 }
 0x348   : > { %v468_v45 = vmul.f32 %v1098_v3, %v467_v44 }
 0x34a   : > { %v470_v46 = vpack.c.bf16 %v468_v45, %v468_v45 }
 0x34c   : > { %v477_v47 = vsel %vm475_vm6, %v470_v46, 0 }
 0x34d   : > { %842 = vmatpush3.bf16.msra.mxu0 %v477_v47 }
 0x350   : > { %844 = vmatmul.mubr.msk.bf16.vlgmr.msra.gmra.mrb[0].mxu0 %vm471_vm7, %v469_v48 }
 0x423   : > { %v513_v49 = vpop.f32.mrb[0].mxu0 }
 0x424   : > { %520 = vadd.xlane.f32.xlu0 %v513_v49  ;;  %v845_v50 = vpop.f32.mrb[1].mxu0  ;;  %v526_v51 = vmul.f32 %v513_v49, %v513_v49 }
 0x425   : > { %v516_v52 = vpop.f32.mrb[2].mxu0 }
 0x426   : > { %527 = vadd.xlane.f32.xlu1 %v526_v51  ;;  %v846_v53 = vpop.f32.mrb[3].mxu0 }
 0x4b1   : > { %v521_v55 = vpop.xlane.xlu0 %520 }
 0x4b2   : > { %v522_v57 = vadd.f32 %v521_v55, %v519_v54 }
 0x4b3   : > { %v528_v58 = vpop.xlane.xlu1 %527 }
 0x4b4   : > { %524 = vst.msk [vmem:[#allocation4] sm:$0xff] %vm523_vm8, %v522_v57  ;;  %v529_v59 = vadd.f32 %v528_v58, %v525_v56 }
 0x4b6   : > { %530 = vst.msk [vmem:[#allocation5] sm:$0xff] %vm523_vm8, %v529_v59 }
 0x4b7 PF: > { %p827_p13 = scmp.ne.s32.totalorder %s981_s19, 2 }
 0x4b8   : > { %v535_v60 = vld [vmem:[#allocation2] sm:$0xff] (!%p827_p13)  ;;  %v537_v61 = vld [vmem:[#allocation3] sm:$0xff] (!%p827_p13)  ;;  %v1015_v6 = vmov (!%p827_p13), 1   ;;  %s1016_s27 = smov (!%p827_p13), 1   ;;  %v1017_v10 = vmov (!%p827_p13), 0   ;;  %s1018_s30 = smov (!%p827_p13), 127  }
 0x4b9   : > { %534 = sbr.rel (%p827_p13) target bundleno = 1965 (0x7ad), region = 56  ;;  %v536_v62 = vmul.f32 (!%p827_p13), 0.0625, %v535_v60  ;;  %v538_v63 = vmul.f32 (!%p827_p13), 0.0625, %v537_v61  ;;  %942 = vset.pattern.permute.xlu0 (!%p827_p13), %v1015_v6  ;;  %941 = vset.pattern.permute.xlu1 (!%p827_p13), %v1017_v10  ;;  %v542_v14 = vld [vmem:[%s1203_s3] sm:$0xff] (!%p827_p13)  ;;  %v1019_v21 = vmov (!%p827_p13), 4   ;;  %v1020_v22 = vmov (!%p827_p13), 5  }
 0x4ba   : > { %v562_v18 = vld [vmem:[%s1201_s1] sm:$0xff] (!%p827_p13)  ;;  %v830_v23 = vld [vmem:[%s1096_s29 + $0x18] sm:$0xff] (!%p827_p13)  ;;  %v1021_v25 = vmov (!%p827_p13), 2   ;;  %s1022_s9 = smov (!%p827_p13), 2   ;;  %v1023_v28 = vmov (!%p827_p13), 3   ;;  %v561_v30 = vld [vmem:[%s1096_s29 + $0x8] sm:$0xff] (!%p827_p13) }
 0x4bb   : > { %v539_v0 = vmul.f32 (!%p827_p13), %v536_v62, %v536_v62  ;;  %v681_v8 = vld [vmem:[#allocation4] sm:$0xff] (!%p827_p13)  ;;  %v560_v29 = vld [vmem:[%s1096_s29] sm:$0xff] (!%p827_p13)  ;;  %v1024_v41 = vmov (!%p827_p13), 0.0   ;;  %vm1025_vm9 = vmmov (!%p827_p13), 0   ;;  %vm582_vm10 = vcmp.lt.s32.totalorder (!%p827_p13), %v1090_v1, 127 }
 0x4bc   : > { %v1147_v9 = vmul.f32 (!%p827_p13), 0.0625, %v681_v8  ;;  %v829_v31 = vld [vmem:[%s1096_s29 + $0x10] sm:$0xff] (!%p827_p13)  ;;  %v688_v37 = vld [vmem:[%s1204_s4] sm:$0xff] (!%p827_p13)  ;;  %847 = vmatprep.subr.bf16.mxu0 (!%p827_p13), %v1024_v41  ;;  %849 = vmatprep.mubr.msk.bf16.mxu0 (!%p827_p13), %vm1025_vm9, %v1024_v41  ;;  %vm637_vm11 = vcmask (!%p827_p13), 1043456   ;;  %vm633_vm12 = vcmask (!%p827_p13), 64512  }
 0x4bd   : > { %v540_v2 = vsub.f32 (!%p827_p13), %v538_v63, %v539_v0  ;;  %v683_v11 = vld [vmem:[#allocation5] sm:$0xff] (!%p827_p13)  ;;  %v828_v46 = vld [vmem:[%s1096_s29 + $0x20] sm:$0xff] (!%p827_p13)  ;;  %v831_v54 = vld [vmem:[%s1096_s29 + $0x30] sm:$0xff] (!%p827_p13) }
 0x4be   : > { %v684_v12 = vmul.f32 (!%p827_p13), 0.0625, %v683_v11  ;;  %v685_v13 = vmul.f32 (!%p827_p13), %v1147_v9, %v1147_v9  ;;  %v631_v11 = vld [vmem:[%s1202_s2] sm:$0xf] (!%p827_p13) }
 0x4bf   : > { %v541_v4 = vmax.f32 (!%p827_p13), %v540_v2, 0.0 }
 0x4c0   : > { %v686_v16 = vsub.f32 %v684_v12, %v685_v13 }
 0x4c1   : > { %v543_v5 = vadd.f32 1e-05, %v541_v4 }
 0x4c2   : > { %v687_v19 = vmax.f32 %v686_v16, 0.0 }
 0x4c3   : > { %951 = vrsqrt.f32 %v543_v5 }
 0x4c4   : > { %v689_v20 = vadd.f32 1e-05, %v687_v19 }
 0x4c6   : > { %953 = vrsqrt.f32 %v689_v20 }
 0x4cd   : > { %v952_v7 = vpop.eup %951 }
 0x4ce   : > { %546 = vrot.lane.b32.xlu0 %v952_v7, %s1016_s27 }
 0x4d0   : > { %v954_v24 = vpop.eup %953 }
 0x540   : > { %v547_v15 = vpop.permute.xlu0 %546 }
 0x541   : > { %v549_v17 = vmul.f32 %v547_v15, %v542_v14 }
 0x543   : > { %551 = vrot.lane.b32.xlu0 %v549_v17, %s1018_s30 }
 0x547   : > { %573 = vperm.xlu0 %942, %v562_v18  }
 0x54b   : > { %945 = vset.pattern.permute.xlu0 %v1019_v21 }
 0x54c   : > { %602 = vperm.xlu0 %945, %v562_v18  }
 0x550   : > { %946 = vset.pattern.permute.xlu0 %v1020_v22 }
 0x551   : > { %613 = vperm.xlu0 %946, %v562_v18  }
 0x555   : > { %609 = vrot.lane.b32.xlu0 %v830_v23, %s1018_s30 }
 0x556   : > { %950 = vset.pattern.permute.xlu0 %v1021_v25 }
 0x559   : > { %692 = vrot.lane.b32.xlu0 %v954_v24, %s1016_s27 }
 0x5b5   : > { %v552_v26 = vpop.permute.xlu0 %551 }
 0x5b6   : > { %v554_v27 = vmul.f32 %v552_v26, %v536_v62 }
 0x5b8   : > { %556 = vrot.lane.b32.xlu1 %v554_v27, %s1022_s9 }
 0x5bc   : > { %565 = vperm.xlu1 %941, %v562_v18  }
 0x5c0   : > { %943 = vset.pattern.permute.xlu1 %v1021_v25 }
 0x5c1   : > { %585 = vperm.xlu1 %943, %v562_v18  }
 0x5c5   : > { %944 = vset.pattern.permute.xlu1 %v1023_v28 }
 0x5c6   : > { %594 = vperm.xlu1 %944, %v562_v18   ;;  %v574_v32 = vpop.permute.xlu0 %573 }
 0x5c7   : > { %v576_v48 = vmul.f32 %v828_v46, %v574_v32 }
 0x5ca   : > { %578 = vrot.lane.b32.xlu1 %v560_v29, %s1018_s30 }
 0x5cb   : > { %947 = vset.pattern.permute.xlu1 %v1015_v6  ;;  %v603_v33 = vpop.permute.xlu0 %602 }
 0x5cc   : > { %v605_v56 = vmul.f32 %v831_v54, %v603_v33 }
 0x5ce   : > { %580 = vrot.lane.b32.xlu1 %v561_v30, %s1018_s30 }
 0x5d0   : > { %v614_v34 = vpop.permute.xlu0 %613 }
 0x5d2   : > { %619 = vperm.xlu1 %947, %v549_v17  }
 0x5d4   : > { %v610_v35 = vpop.permute.xlu0 %609 }
 0x5d6   : > { %607 = vrot.lane.b32.xlu1 %v829_v31, %s1018_s30 }
 0x5d7   : > { %948 = vset.pattern.permute.xlu1 %v1021_v25 }
 0x5d8   : > { %v693_v38 = vpop.permute.xlu0 %692 }
 0x5d9   : > { %v695_v40 = vmul.f32 %v693_v38, %v688_v37 }
 0x62a   : > { %v557_v36 = vpop.permute.xlu1 %556 }
 0x62b   : > { %v559_v39 = vsub.f32 %v542_v14, %v557_v36 }
 0x62d   : > { %625 = vperm.xlu1 %948, %v559_v39  }
 0x631   : > { %697 = vrot.lane.b32.xlu1 %v695_v40, %s1018_s30 }
 0x632   : > { %949 = vset.pattern.permute.xlu1 %v1015_v6 }
 0x635   : > { %707 = vperm.xlu1 %949, %v695_v40  }
 0x63b   : > { %v566_v42 = vpop.permute.xlu1 %565 }
 0x63c   : > { %v568_v47 = vmul.f32 %v566_v42, %v560_v29 }
 0x63e   : > { %v577_v51 = vadd.f32 %v576_v48, %v568_v47 }
 0x640   : > { %v586_v43 = vpop.permute.xlu1 %585 }
 0x645   : > { %v595_v44 = vpop.permute.xlu1 %594 }
 0x646   : > { %v597_v52 = vmul.f32 %v829_v31, %v595_v44 }
 0x649   : > { %v579_v45 = vpop.permute.xlu1 %578 }
 0x64d   : > { %v581_v49 = vpop.permute.xlu1 %580 }
 0x64e   : > { %v583_v50 = vsel %vm582_vm10, %v579_v45, %v581_v49 }
 0x64f   : > { %v588_v53 = vmul.f32 %v586_v43, %v583_v50 }
 0x651   : > { %v589_v55 = vadd.f32 %v588_v53, %v577_v51  ;;  %v620_v59 = vpop.permute.xlu1 %619 }
 0x653   : > { %v598_v57 = vadd.f32 %v597_v52, %v589_v55 }
 0x655   : > { %v606_v58 = vadd.f32 %v605_v56, %v598_v57  ;;  %v608_v60 = vpop.permute.xlu1 %607 }
 0x656   : > { %v611_v61 = vsel %vm582_vm10, %v608_v60, %v610_v35 }
 0x657   : > { %v616_v62 = vmul.f32 %v614_v34, %v611_v61 }
 0x659   : > { %v617_v63 = vadd.f32 %v616_v62, %v606_v58 }
 0x65b   : > { %v622_v0 = vmul.f32 %v620_v59, %v617_v63 }
 0x6ac   : > { %v626_v2 = vpop.permute.xlu1 %625 }
 0x6ad   : > { %v628_v4 = vadd.f32 %v626_v2, %v622_v0 }
 0x6af   : > { %v629_v1 = vmax.f32 %v628_v4, 0.0 }
 0x6b0   : > { %v698_v5 = vpop.permute.xlu1 %697 }
 0x6b1   : > { %v630_v6 = vmul.f32 %v1098_v3, %v629_v1  ;;  %v700_v7 = vmul.f32 %v698_v5, %v1147_v9 }
 0x6b3   : > { %v632_v8 = vpack.c.bf16 %v630_v6, %v630_v6  ;;  %702 = vrot.lane.b32.xlu0 %v700_v7, %s1022_s9 }
 0x6b4   : > { %v708_v17 = vpop.permute.xlu1 %707 }
 0x6b5   : > { %v639_v10 = vsel %vm637_vm11, %v632_v8, 0 }
 0x6b6   : > { %848 = vmatpush3.bf16.msra.mxu0 %v639_v10 }
 0x6b9   : > { %850 = vmatmul.mubr.msk.bf16.vlgmr.msra.gmra.mrb[0].mxu0 %vm633_vm12, %v631_v11 }
 0x725   : > { %v703_v12 = vpop.permute.xlu0 %702 }
 0x726   : > { %v705_v13 = vsub.f32 %v688_v37, %v703_v12 }
 0x728   : > { %713 = vperm.xlu0 %950, %v705_v13  }
 0x78c   : > { %v675_v14 = vpop.f32.mrb[0].mxu0 }
 0x78d   : > { %v851_v15 = vpop.f32.mrb[1].mxu0  ;;  %v710_v18 = vmul.f32 %v708_v17, %v675_v14 }
 0x78e   : > { %v678_v16 = vpop.f32.mrb[2].mxu0 }
 0x78f   : > { %v852_v9 = vpop.f32.mrb[3].mxu0 }
 0x7a7   : > { %v714_v19 = vpop.permute.xlu0 %713 }
 0x7a8   : > { %v716_v20 = vadd.f32 %v714_v19, %v710_v18 }
 0x7aa   : > { %v717_v21 = vmul.f32 %v1098_v3, %v716_v20 }
 0x7ac   : > { %718 = vst [vmem:[%s1103_s8] sm:$0xff] %v717_v21 }
 0x7ad PF: > { %s15_s22 = sadd.s32 1, %s993_s22   ;;  %s1206_s18 = smov %s985_s20 }
 0x7ae   : > { %p12_p0 = scmp.ge.s32.totalorder %s15_s22, 8   ;;  %s1207_s19 = smov %s989_s21 }
 0x7af   : > { %s1208_s20 = smov %s1211_s23  ;;  %s1209_s21 = smov %s1215_s24 }
 0x7b0   :  { %14 = sbr.rel (!%p12_p0) target bundleno = 3 (0x3), region = 95 }

</bundles_post_ra>
